<compile_context>
chip_gen: v7x
topology: tpu7x:2x2x1
jax: 0.10.0
libtpu: 0.0.40
codegen_flags: <defaults>
</compile_context>

<pallas_src>
import jax
import jax.numpy as jnp
from jax.experimental import pallas as pl
from jax.experimental.pallas import tpu as pltpu


def qnet_kernel(x_ref, w1_ref, b1_ref, w2_ref, b2_ref, out_ref):
    # fc1: MXU matmul with f32 accumulation; bias add + ReLU on the VPU.
    w1 = w1_ref[...]
    w2 = w2_ref[...]
    x = x_ref[...].astype(w1.dtype)
    h = jnp.dot(x, w1, preferred_element_type=jnp.float32)
    h = jnp.maximum(h + b1_ref[...], 0.0)          # b1 is (1, H) f32 -> broadcasts
    # fc2: narrow (action_dim-wide) output; masked vst cost << byte savings.
    o = jnp.dot(h.astype(w2.dtype), w2, preferred_element_type=jnp.float32)
    out_ref[...] = (o + b2_ref[...]).astype(out_ref.dtype)


def prepare_qnet_params(w1, b1, w2, b2, dtype=jnp.float32):
    """Pack Qnet params once (hoisted out of the per-call hot path).

    w1: [state_dim, hidden]   (transposed from PyTorch's [out, in])
    b1: [hidden]
    w2: [hidden, action_dim]
    b2: [action_dim]
    dtype: weight dtype for the MXU (jnp.float32 or jnp.bfloat16).
    Biases stay f32 (bias/ReLU/output are computed in f32).
    """
    H = w1.shape[1]
    A = w2.shape[1]
    return dict(
        w1=jnp.asarray(w1, dtype),
        b1=jnp.asarray(b1, jnp.float32).reshape(1, H),
        w2=jnp.asarray(w2, dtype),
        b2=jnp.asarray(b2, jnp.float32).reshape(1, A),
    )


def _batch_axis_semantics():
    # Only CORE_PARALLEL actually splits a grid axis across v7x's two
    # TensorCores; plain "parallel" is safe everywhere but a codegen no-op.
    try:
        kind = jax.devices()[0].device_kind.lower()
    except Exception:
        kind = ""
    if "v7" in kind and hasattr(pltpu, "CORE_PARALLEL"):
        return (pltpu.CORE_PARALLEL,)
    return ("parallel",)


def qnet_forward(x, params, *, batch_tile=1024, gridless_max=4096):
    """Qnet forward.  x: [B, state_dim] f32 (or bf16 to also halve input DMA)."""
    B, S = x.shape
    w1, b1, w2, b2 = params["w1"], params["b1"], params["w2"], params["b2"]
    H = w1.shape[1]
    A = w2.shape[1]
    out_shape = jax.ShapeDtypeStruct((B, A), jnp.float32)

    if B <= gridless_max:
        # Inference / modest batches: gridless call, all operands resident in
        # VMEM (no grid loop, no pipeline prologue). 4096x4 f32 x + weights is
        # far under the scoped-VMEM default on v5e/v6e/v7x.
        vmem = pl.BlockSpec(memory_space=pltpu.MemorySpace.VMEM)
        return pl.pallas_call(
            qnet_kernel,
            out_shape=out_shape,
            in_specs=[vmem, vmem, vmem, vmem, vmem],
            out_specs=vmem,
        )(x, w1, b1, w2, b2)

    # Training-sized batch: tile ONLY the batch axis; weights/biases stay
    # VMEM-resident via constant (0, 0) index maps.  cdiv grid: the ragged
    # tail block is masked by Pallas (rows are independent, overhanging
    # output rows are discarded).
    TB = batch_tile
    return pl.pallas_call(
        qnet_kernel,
        out_shape=out_shape,
        grid_spec=pltpu.PrefetchScalarGridSpec(
            num_scalar_prefetch=0,
            grid=(pl.cdiv(B, TB),),
            in_specs=[
                pl.BlockSpec((TB, S), lambda i: (i, 0)),   # x: batch-tiled, unpadded
                pl.BlockSpec((S, H), lambda i: (0, 0)),    # w1: resident
                pl.BlockSpec((1, H), lambda i: (0, 0)),    # b1: resident
                pl.BlockSpec((H, A), lambda i: (0, 0)),    # w2: resident
                pl.BlockSpec((1, A), lambda i: (0, 0)),    # b2: resident
            ],
            out_specs=pl.BlockSpec((TB, A), lambda i: (i, 0)),
        ),
        compiler_params=pltpu.CompilerParams(
            dimension_semantics=_batch_axis_semantics(),
        ),
    )(x, w1, b1, w2, b2)


def reference_forward(x, w1, b1, w2, b2):
    h = jnp.maximum(x @ w1 + b1.reshape(1, -1), 0.0)
    return h @ w2 + b2.reshape(1, -1)


if __name__ == "__main__":
    # CartPole-v0: state_dim=4, action_dim=2; hidden_dim=128 per the module.
    state_dim, hidden_dim, action_dim = 4, 128, 2

    key = jax.random.PRNGKey(0)
    kx, k1, k2, k3, k4, kt = jax.random.split(key, 6)

    # PyTorch-Linear-like init: U(-1/sqrt(fan_in), +1/sqrt(fan_in)).
    bound1 = 1.0 / jnp.sqrt(jnp.float32(state_dim))
    bound2 = 1.0 / jnp.sqrt(jnp.float32(hidden_dim))
    w1 = jax.random.uniform(k1, (state_dim, hidden_dim), jnp.float32, -bound1, bound1)
    b1 = jax.random.uniform(k2, (hidden_dim,), jnp.float32, -bound1, bound1)
    w2 = jax.random.uniform(k3, (hidden_dim, action_dim), jnp.float32, -bound2, bound2)
    b2 = jax.random.uniform(k4, (action_dim,), jnp.float32, -bound2, bound2)

    # Params packed ONCE (cast + bias reshape) outside the per-call hot path.
    params_f32 = prepare_qnet_params(w1, b1, w2, b2, dtype=jnp.float32)
    params_bf16 = prepare_qnet_params(w1, b1, w2, b2, dtype=jnp.bfloat16)

    # 1) Inference-sized batch -> gridless, all-VMEM path (exact f32).
    x_small = jax.random.normal(kx, (8, state_dim), dtype=jnp.float32)
    out_small = jax.block_until_ready(qnet_forward(x_small, params_f32))
    ref_small = reference_forward(x_small, w1, b1, w2, b2)
    assert out_small.shape == (8, action_dim)
    assert jnp.allclose(out_small, ref_small, atol=1e-5, rtol=1e-5), "small-batch mismatch"

    # 2) Batch-tiled path with a ragged tail (grid = cdiv(20, 8) = 3 blocks),
    #    exercised at small shapes by forcing the tiled branch.
    x_tail = jax.random.normal(kt, (20, state_dim), dtype=jnp.float32)
    out_tail = jax.block_until_ready(
        qnet_forward(x_tail, params_f32, batch_tile=8, gridless_max=0))
    ref_tail = reference_forward(x_tail, w1, b1, w2, b2)
    assert out_tail.shape == (20, action_dim)
    assert jnp.allclose(out_tail, ref_tail, atol=1e-5, rtol=1e-5), "tiled/tail mismatch"

    # 3) bf16 weights (halved weight DMA), f32 accumulation -> relaxed tol.
    out_bf16 = jax.block_until_ready(qnet_forward(x_small, params_bf16))
    assert out_bf16.shape == (8, action_dim)
    assert jnp.allclose(out_bf16, ref_small, atol=3e-2, rtol=3e-2), "bf16 mismatch"

    print("KERNEL_OK")
</pallas_src>

<mosaic_0001>
module attributes {stable_mosaic.version = 11 : i64} {
  func.func @qnet_kernel(%arg0: memref<8x4xf32, #tpu.memory_space<vmem>>, %arg1: memref<4x128xf32, #tpu.memory_space<vmem>>, %arg2: memref<1x128xf32, #tpu.memory_space<vmem>>, %arg3: memref<128x2xf32, #tpu.memory_space<vmem>>, %arg4: memref<1x2xf32, #tpu.memory_space<vmem>>, %arg5: memref<8x2xf32, #tpu.memory_space<vmem>>) attributes {dimension_semantics = [], scalar_prefetch = 0 : i64, scratch_operands = 0 : i64, tpu.core_type = #tpu.core_type<tc>} {
    %c0 = arith.constant 0 : index
    %c0_0 = arith.constant 0 : index
    %0 = vector.load %arg1[%c0, %c0_0] : memref<4x128xf32, #tpu.memory_space<vmem>>, vector<4x128xf32>
    %c0_1 = arith.constant 0 : index
    %c0_2 = arith.constant 0 : index
    %1 = vector.load %arg3[%c0_1, %c0_2] : memref<128x2xf32, #tpu.memory_space<vmem>>, vector<128x2xf32>
    %c0_3 = arith.constant 0 : index
    %c0_4 = arith.constant 0 : index
    %2 = vector.load %arg0[%c0_3, %c0_4] : memref<8x4xf32, #tpu.memory_space<vmem>>, vector<8x4xf32>
    %cst = arith.constant dense<0.000000e+00> : vector<8x128xf32>
    %3 = tpu.matmul %2, %0, %cst {dimension_numbers = #tpu.dot_dimension_numbers<[1], [0], [0], [1], [0, 0, 1, 1], [], []>} : vector<8x4xf32>, vector<4x128xf32>, vector<8x128xf32> -> vector<8x128xf32>
    %c0_5 = arith.constant 0 : index
    %c0_6 = arith.constant 0 : index
    %4 = vector.load %arg2[%c0_5, %c0_6] : memref<1x128xf32, #tpu.memory_space<vmem>>, vector<1x128xf32>
    %5 = vector.broadcast %4 : vector<1x128xf32> to vector<8x128xf32>
    %6 = arith.addf %3, %5 : vector<8x128xf32>
    %cst_7 = arith.constant 0.000000e+00 : f32
    %7 = vector.broadcast %cst_7 : f32 to vector<8x128xf32>
    %8 = arith.maximumf %6, %7 : vector<8x128xf32>
    %cst_8 = arith.constant dense<0.000000e+00> : vector<8x2xf32>
    %9 = tpu.matmul %8, %1, %cst_8 {dimension_numbers = #tpu.dot_dimension_numbers<[1], [0], [0], [1], [0, 0, 1, 1], [], []>} : vector<8x128xf32>, vector<128x2xf32>, vector<8x2xf32> -> vector<8x2xf32>
    %c0_9 = arith.constant 0 : index
    %c0_10 = arith.constant 0 : index
    %10 = vector.load %arg4[%c0_9, %c0_10] : memref<1x2xf32, #tpu.memory_space<vmem>>, vector<1x2xf32>
    %11 = vector.broadcast %10 : vector<1x2xf32> to vector<8x2xf32>
    %12 = arith.addf %9, %11 : vector<8x2xf32>
    %c0_11 = arith.constant 0 : index
    %c0_12 = arith.constant 0 : index
    %13 = vector.load %arg5[%c0_11, %c0_12] : memref<8x2xf32, #tpu.memory_space<vmem>>, vector<8x2xf32>
    tpu.vector_store %arg5[%c0_11, %c0_12], %12 {strides = array<i32>} : memref<8x2xf32, #tpu.memory_space<vmem>>, vector<8x2xf32>,
    return
  }
}

</mosaic_0001>

<bundles_post_ra>
// kernel: tpu_custom_call.1
= control target key start
LH: loop header
LB: loop body
LE: loop exit
PB: predicated region body
PF: predicated region fallthrough
CT: control target
= control target key end

     0   :  { %vm49_vm0 = vcmask 1043456   ;;  %vm45_vm1 = vcmask 31744   ;;  %v297_v0 = vmov 0.0   ;;  %vm298_vm2 = vmmov 0   ;;  %s393_s1 = inlined_call_operand.vmem [shape: f32[4,128], index: 1, kind: input, shape index: {}]   ;;  %s394_s0 = inlined_call_operand.vmem [shape: f32[8,4], index: 0, kind: input, shape index: {}]   ;;  %s395_s3 = inlined_call_operand.vmem [shape: f32[128,2], index: 3, kind: input, shape index: {}]   ;;  %s396_s2 = inlined_call_operand.vmem [shape: f32[1,128], index: 2, kind: input, shape index: {}]   ;;  %s397_s4 = inlined_call_operand.vmem [shape: f32[1,2], index: 4, kind: input, shape index: {}]   ;;  %s398_s5 = inlined_call_operand.vmem [shape: f32[8,2], index: 5, kind: output, shape index: {}]  }
   0x1   :  { %230 = vmatprep.subr.mxu0 %v297_v0  ;;  %v20_v1 = vld [vmem:[%s393_s1] sm:$0xf]  ;;  %232 = vmatprep.mubr.msk.f32.mxu0 %vm298_vm2, %v297_v0  ;;  %v299_v4 = vmov 0.0|0.0   ;;  %v22_v5 = vld [vmem:[%s395_s3 + $0x8] sm:$0xff]  ;;  %v23_v6 = vld [vmem:[%s395_s3 + $0x10] sm:$0xff]  ;;  %vm201_vm3 = vcmask 15360  }
   0x2   :  { %v37_v2 = vld [vmem:[%s394_s0] sm:$0xff]  ;;  %231 = vmatpush3.msk.msra.mxu0 %vm49_vm0, %v20_v1  ;;  %270 = vmatprep.subr.bf16.mxu1 %v299_v4  ;;  %v24_v7 = vld [vmem:[%s395_s3 + $0x18] sm:$0xff]  ;;  %v26_v11 = vld [vmem:[%s395_s3 + $0x28] sm:$0xff] }
   0x3   :  { %v21_v3 = vld [vmem:[%s395_s3] sm:$0xff]  ;;  %233 = vmatmul.mubr.msk.f32.vlgmr.msra.gmra.mrb[0].mxu0 %vm45_vm1, %v37_v2  ;;  %267 = vmatprep.mubr.msk.f32.mxu1 %vm298_vm2, %v297_v0  ;;  %v274_v9 = vpack.c.bf16 %v24_v7, %v23_v6  ;;  %v27_v13 = vld [vmem:[%s395_s3 + $0x30] sm:$0xff]  ;;  %v28_v14 = vld [vmem:[%s395_s3 + $0x38] sm:$0xff] }
   0x4   :  { %v271_v8 = vpack.c.bf16 %v22_v5, %v21_v3  ;;  %v25_v10 = vld [vmem:[%s395_s3 + $0x20] sm:$0xff]  ;;  %v280_v15 = vpack.c.bf16 %v28_v14, %v27_v13  ;;  %v30_v17 = vld [vmem:[%s395_s3 + $0x48] sm:$0xff]  ;;  %v31_v19 = vld [vmem:[%s395_s3 + $0x50] sm:$0xff] }
   0x5   :  { %v277_v12 = vpack.c.bf16 %v26_v11, %v25_v10  ;;  %v29_v16 = vld [vmem:[%s395_s3 + $0x40] sm:$0xff]  ;;  %v32_v20 = vld [vmem:[%s395_s3 + $0x58] sm:$0xff]  ;;  %v34_v23 = vld [vmem:[%s395_s3 + $0x68] sm:$0xff] }
   0x6   :  { %272 = vmatpush3.bf16.msra.mxu1 %v271_v8  ;;  %v283_v18 = vpack.c.bf16 %v30_v17, %v29_v16  ;;  %v286_v21 = vpack.c.bf16 %v32_v20, %v31_v19  ;;  %v33_v22 = vld [vmem:[%s395_s3 + $0x60] sm:$0xff]  ;;  %v35_v25 = vld [vmem:[%s395_s3 + $0x70] sm:$0xff]  ;;  %v36_v26 = vld [vmem:[%s395_s3 + $0x78] sm:$0xff] }
   0x7   :  { %273 = vmatprep.subr.bf16.mxu1 %v299_v4  ;;  %v289_v24 = vpack.c.bf16 %v34_v23, %v33_v22  ;;  %v292_v27 = vpack.c.bf16 %v36_v26, %v35_v25  ;;  %v207_v28 = vld [vmem:[%s396_s2] ss:$0 sm:$0xff] }
   0x8   :  { %v210_v33 = vld [vmem:[%s397_s4] ss:$0 sm:$0xff] }
   0xa   :  { %275 = vmatpush3.bf16.msra.mxu1 %v274_v9 }
   0xb   :  { %276 = vmatprep.subr.bf16.mxu1 %v299_v4 }
   0xe   :  { %278 = vmatpush3.bf16.msra.mxu1 %v277_v12 }
   0xf   :  { %279 = vmatprep.subr.bf16.mxu1 %v299_v4 }
  0x12   :  { %281 = vmatpush3.bf16.msra.mxu1 %v280_v15 }
  0x13   :  { %282 = vmatprep.subr.bf16.mxu1 %v299_v4 }
  0x16   :  { %284 = vmatpush3.bf16.msra.mxu1 %v283_v18 }
  0x17   :  { %285 = vmatprep.subr.bf16.mxu1 %v299_v4 }
  0x1a   :  { %287 = vmatpush3.bf16.msra.mxu1 %v286_v21 }
  0x1b   :  { %288 = vmatprep.subr.bf16.mxu1 %v299_v4 }
  0x1e   :  { %290 = vmatpush3.bf16.msra.mxu1 %v289_v24 }
  0x1f   :  { %291 = vmatprep.subr.bf16.mxu1 %v299_v4 }
  0x22   :  { %293 = vmatpush3.bf16.msra.mxu1 %v292_v27 }
  0xd6   :  { %v119_v29 = vpop.f32.mrb[0].mxu0 }
  0xd7   :  { %v120_v30 = vadd.f32 %v207_v28, %v119_v29  ;;  %v234_v31 = vpop.f32.mrb[1].mxu0 }
  0xd9   :  { %v123_v32 = vmax.f32 %v120_v30, 0.0 }
  0xdb   :  { %268 = vmatmul.mubr.f32.vlgmr.msra.gmra.mrb[0].mxu1 %v123_v32 }
 0x1ae   :  { %v197_v34 = vpop.f32.mrb[0].mxu1 }
 0x1af   :  { %v198_v35 = vadd.f32 %v210_v33, %v197_v34  ;;  %v269_v36 = vpop.f32.mrb[1].mxu1 }
 0x1b1   :  { %202 = vst.msk [vmem:[%s398_s5] sm:$0xff] %vm201_vm3, %v198_v35 }

</bundles_post_ra>
